<compile_context>
chip_gen: v7x
topology: tpu7x:2x2x1
jax: 0.10.0
libtpu: 0.0.40
codegen_flags: <defaults>
</compile_context>

<pallas_src>
import functools
import math

import jax
import jax.numpy as jnp
from jax import lax
from jax.experimental import pallas as pl
from jax.experimental.pallas import tpu as pltpu


def _round_up(v, m):
    return ((v + m - 1) // m) * m


def _gem_kernel(p_ref, x_ref, o_ref, *, eps, log_hw, hw, k, int_p):
    """One row block. Rows are (folded) (n, c) records, lanes are spatial.

    p_ref: SMEM (1,) f32.  x_ref: VMEM (tm, k*hw).  o_ref: VMEM (tm, k).
    """
    p = p_ref[0]
    x = x_ref[...].astype(jnp.float32)
    xc = jnp.maximum(x, eps)                         # clamp(min=eps) -> > 0

    if int_p is not None:
        # Static small-integer exponent: pure VPU multiplies, no EUP work.
        xp = xc
        for _ in range(int_p - 1):
            xp = xp * xc
    else:
        # General exponent: x^p = exp(p * log(x)) on the EUP.
        # TODO(synk): optional bf16 log/exp for bf16 inputs on v6e/v7x
        # (EUP-bound there); kept in f32 to preserve f32-exact semantics.
        xp = jnp.exp(p * jnp.log(xc))

    if k == 1:
        s = jnp.sum(xp, axis=-1, keepdims=True)      # (tm, 1)
    else:
        # Segmented row sums over the k folded records, using the idle MXU.
        # seg[l, j] = 1.0 iff lane l belongs to folded record j
        # (comparison form avoids integer division in the kernel).
        lane = lax.broadcasted_iota(jnp.int32, (k * hw, k), 0)
        rec = lax.broadcasted_iota(jnp.int32, (k * hw, k), 1)
        seg = ((lane >= rec * hw) & (lane < (rec + 1) * hw)).astype(jnp.float32)
        s = jnp.dot(xp, seg, preferred_element_type=jnp.float32)   # (tm, k)

    # (mean)^(1/p) = exp((log(sum) - log(HW)) / p): one log + one exp per row.
    # Note: a row that is entirely <= eps gives s = HW * eps^p; for p >~ 12
    # that underflows f32 (corner case, harmless for typical p ~ 3).
    o_ref[...] = jnp.exp((jnp.log(s) - log_hw) / p).astype(o_ref.dtype)


def gem_pallas(x, p, eps=1e-6, *, tile_bytes=8 * 1024 * 1024):
    """GeM pooling. x: (N, C, H, W); p: shape-(1,) parameter. Returns (N, C, 1, 1)."""
    N, C, H, W = x.shape
    NC, HW = N * C, H * W
    itemsize = jnp.dtype(x.dtype).itemsize

    # ---- Fold k records per lane-row when HW is lane-sparse (< 128 lanes). ----
    k = 1
    if HW < 128:
        best = HW / _round_up(HW, 128)
        for cand in range(2, 17):
            if NC % cand != 0 or NC // cand < 8:
                continue
            dens = (cand * HW) / _round_up(cand * HW, 128)
            if dens > best + 1e-9:
                best, k = dens, cand
    rows, width = NC // k, k * HW
    x2 = x.reshape(rows, width)                      # contiguous view, no copy

    # ---- Row-tile sizing against the lane-padded VMEM footprint. ----
    width_pad = _round_up(width, 128)
    bytes_per_row = width_pad * itemsize
    rows_fit = max(8, (tile_bytes // bytes_per_row) // 8 * 8)
    if rows >= 8:
        tm = min(_round_up(rows, 8), rows_fit, 4096)
        # Keep >= ~4 grid steps so double-buffering overlaps DMA with compute
        # and the ("parallel",) axis can shard across v7x's two TensorCores.
        tm = min(tm, max(8, _round_up(pl.cdiv(rows, 4), 8)))
    else:
        tm = rows                                    # block == full (tiny) array
    num_blocks = pl.cdiv(rows, tm)                   # ragged last block, no pad

    # Double-buffered input tile + (lane-padded) output tile + slack.
    vmem_needed = 2 * tm * bytes_per_row + 2 * tm * 128 * itemsize + (2 << 20)
    vmem_limit = int(min(128 << 20, max(32 << 20, vmem_needed)))

    p_f32 = jnp.asarray(p, jnp.float32).reshape((1,))
    try:  # concrete p -> compile only the one specialized kernel
        p_static = float(p_f32[0])
    except Exception:  # traced under jit
        p_static = None

    def call(int_p):
        kernel = functools.partial(
            _gem_kernel, eps=float(eps), log_hw=math.log(HW), hw=HW, k=k,
            int_p=int_p)
        transcendentals = 2 * NC if int_p is not None else 2 * NC * HW + 2 * NC
        return pl.pallas_call(
            kernel,
            out_shape=jax.ShapeDtypeStruct((rows, k), x.dtype),
            grid=(num_blocks,),
            in_specs=[
                pl.BlockSpec(memory_space=pltpu.MemorySpace.SMEM),  # p scalar
                pl.BlockSpec((tm, width), lambda i: (i, 0)),        # x row tile
            ],
            out_specs=pl.BlockSpec((tm, k), lambda i: (i, 0)),
            compiler_params=pltpu.CompilerParams(
                dimension_semantics=("parallel",),
                vmem_limit_bytes=vmem_limit,
            ),
            cost_estimate=pl.CostEstimate(
                flops=4 * NC * HW + 4 * NC,
                transcendentals=transcendentals,
                bytes_accessed=NC * HW * itemsize + NC * itemsize,
            ),
        )(p_f32, x2)

    if p_static is not None:
        ip = int(round(p_static))
        int_p = ip if (p_static == float(ip) and 1 <= ip <= 4) else None
        out = call(int_p)
    else:
        # Runtime p: specialize the module default p == 3, general otherwise.
        out = lax.cond(p_f32[0] == 3.0, lambda: call(3), lambda: call(None))

    return out.reshape(N, C, 1, 1)


def _gem_reference(x, p, eps):
    return jnp.power(
        jnp.mean(jnp.power(jnp.maximum(x, eps), p[0]), axis=(2, 3), keepdims=True),
        1.0 / p[0])


if __name__ == "__main__":
    eps = 1e-6

    # Main example (matches nn.Parameter(torch.ones(1) * 3.0)).
    key = jax.random.PRNGKey(0)
    N, C, H, W = 2, 4, 16, 16
    x = jax.random.normal(key, (N, C, H, W), dtype=jnp.float32)
    p = jnp.ones((1,), dtype=jnp.float32) * 3.0

    out = gem_pallas(x, p, eps)
    jax.block_until_ready(out)
    ref = _gem_reference(x, p, eps)
    assert out.shape == (N, C, 1, 1)
    assert jnp.allclose(out, ref, rtol=1e-4, atol=1e-6), "p=3 path mismatch"

    # Also exercise the lane-folding (HW=7x7=49 < 128), ragged-grid tail and
    # general (non-integer p) exp/log path.
    x2 = jax.random.normal(jax.random.PRNGKey(1), (4, 25, 7, 7), dtype=jnp.float32)
    p2 = jnp.ones((1,), dtype=jnp.float32) * 2.5
    out2 = gem_pallas(x2, p2, eps)
    jax.block_until_ready(out2)
    ref2 = _gem_reference(x2, p2, eps)
    assert out2.shape == (4, 25, 1, 1)
    assert jnp.allclose(out2, ref2, rtol=1e-4, atol=1e-6), "general-p path mismatch"

    print("KERNEL_OK")
</pallas_src>

<mosaic_0001>
module attributes {stable_mosaic.version = 11 : i64} {
  func.func @_gem_kernel(%arg0: i32, %arg1: memref<1xf32, #tpu.memory_space<smem>>, %arg2: memref<8x256xf32, #tpu.memory_space<vmem>>, %arg3: memref<8x1xf32, #tpu.memory_space<vmem>>) attributes {dimension_semantics = [#tpu.dimension_semantics<parallel>], iteration_bounds = array<i64: 1>, scalar_prefetch = 0 : i64, scratch_operands = 0 : i64, tpu.core_type = #tpu.core_type<tc>, window_params = [{transform_indices = @transform_0, window_bounds = array<i64: 1>}, {transform_indices = @transform_1, window_bounds = array<i64: 8, 256>}, {transform_indices = @transform_2, window_bounds = array<i64: 8, 1>}]} {
    %c0 = arith.constant 0 : index
    %0 = memref.load %arg1[%c0] : memref<1xf32, #tpu.memory_space<smem>>
    %c0_0 = arith.constant 0 : index
    %c0_1 = arith.constant 0 : index
    %1 = vector.load %arg2[%c0_0, %c0_1] : memref<8x256xf32, #tpu.memory_space<vmem>>, vector<8x256xf32>
    %cst = arith.constant 9.99999997E-7 : f32
    %2 = vector.broadcast %cst : f32 to vector<8x256xf32>
    %3 = arith.maximumf %1, %2 : vector<8x256xf32>
    %4 = arith.mulf %3, %3 : vector<8x256xf32>
    %5 = arith.mulf %4, %3 : vector<8x256xf32>
    %cst_2 = arith.constant dense<0.000000e+00> : vector<8xf32>
    %6 = vector.multi_reduction <add>, %5, %cst_2 [1] : vector<8x256xf32> to vector<8xf32>
    %7 = vector.shape_cast %6 : vector<8xf32> to vector<8x1xf32>
    %8 = math.log %7 : vector<8x1xf32>
    %cst_3 = arith.constant 5.54517746 : f32
    %9 = vector.broadcast %cst_3 : f32 to vector<8x1xf32>
    %10 = arith.subf %8, %9 : vector<8x1xf32>
    %11 = vector.broadcast %0 : f32 to vector<8x1xf32>
    %12 = arith.divf %10, %11 : vector<8x1xf32>
    %13 = math.exp %12 : vector<8x1xf32>
    %c0_4 = arith.constant 0 : index
    %c0_5 = arith.constant 0 : index
    %14 = vector.load %arg3[%c0_4, %c0_5] : memref<8x1xf32, #tpu.memory_space<vmem>>, vector<8x1xf32>
    tpu.vector_store %arg3[%c0_4, %c0_5], %13 {strides = array<i32>} : memref<8x1xf32, #tpu.memory_space<vmem>>, vector<8x1xf32>,
    return
  }
  func.func @transform_0(%arg0: i32) -> i32 {
    %c0_i32 = arith.constant 0 : i32
    %c0_i32_0 = arith.constant 0 : i32
    return %c0_i32 : i32
  }
  func.func @transform_1(%arg0: i32) -> (i32, i32) {
    %c0_i32 = arith.constant 0 : i32
    %c0_i32_0 = arith.constant 0 : i32
    return %arg0, %c0_i32 : i32, i32
  }
  func.func @transform_2(%arg0: i32) -> (i32, i32) {
    %c0_i32 = arith.constant 0 : i32
    %c0_i32_0 = arith.constant 0 : i32
    return %arg0, %c0_i32 : i32, i32
  }
}

</mosaic_0001>

<bundles_post_ra>
// kernel: tpu_custom_call.1
= control target key start
LH: loop header
LB: loop body
LE: loop exit
PB: predicated region body
PF: predicated region fallthrough
CT: control target
= control target key end

     0   :  { %8 = vsyncpa [#allocation4], 0  ;;  %s83_s9 = smov [#allocation3]   ;;  %s117_s0 = inlined_call_operand.<no memory space> [shape: f32[1], index: 0, kind: input, shape index: {}]   ;;  %s118_s1 = inlined_call_operand.hbm [shape: f32[8,256], index: 1, kind: input, shape index: {}]   ;;  %s119_s2 = inlined_call_operand.vmem [shape: f32[8,1], index: 2, kind: output, shape index: {}]  }
   0x1   :  { %s17_s10 = sshll.u32 %s83_s9, 4  ;;  %s59_s13 = scalar_lea.hbm %s118_s1, 256  ;;  %s18_s10 = int_to_ptr.vmem [resolvable:$true] %s17_s10 }
   0x2   :  { %p60_p0 = scmp.ne.s32.totalorder %s118_s1, %s59_s13  ;;  %p63_p1 = scmp.lt.u32.totalorder %s59_s13, %s118_s1 }
   0x4   :  { %p65_p2 = pnand %p63_p1, %p60_p0 }
   0x6   :  { %68 = shalt.err (!%p65_p2)
}
   0x7   :  { %s69_s18 = scalar_lea.vmem %s18_s10, 256  ;;  %p74_p4 = scmp.lt.s32.totalorder %s18_s10, %s18_s10 }
   0x8   :  { %p70_p3 = scmp.ne.s32.totalorder %s18_s10, %s69_s18  ;;  %p75_p5 = scmp.lt.s32.totalorder %s69_s18, %s69_s18 }
   0xa   :  { %p76_p6 = por %p75_p5, %p74_p4 }
   0xc   :  { %p77_p7 = pnand %p76_p6, %p70_p3 }
   0xe   :  { %80 = shalt.err (!%p77_p7)
}
   0xf   :  { %20 = dma.hbm_to_vmem [thread:$0]  %s118_s1, 256, %s18_s10, [#allocation4]  }
  0x10   :  { %81 = dma.done.wait [#allocation4], 256  }
  0x11   :  { %82 = vsyncadd [#allocation4], 4294967040  ;;  %v25_v0 = vld [vmem:[#allocation3] sm:$0xff]  ;;  %v26_v1 = vld [vmem:[#allocation3 + $0x8] sm:$0xff]  ;;  %v39_v10 = vstv %s117_s0  ;;  %vm44_vm0 = vcmask 7168  }
  0x12   :  { %v27_v2 = vmax.f32 %v25_v0, 1e-06  ;;  %v28_v3 = vmax.f32 %v26_v1, 1e-06 }
  0x14   :  { %v29_v4 = vmul.f32 %v27_v2, %v27_v2  ;;  %v30_v5 = vmul.f32 %v28_v3, %v28_v3 }
  0x16   :  { %v31_v6 = vmul.f32 %v29_v4, %v27_v2  ;;  %v32_v7 = vmul.f32 %v30_v5, %v28_v3 }
  0x18   :  { %v33_v8 = vadd.f32 %v32_v7, %v31_v6 }
  0x1a   :  { %34 = vadd.xlane.f32.xlu0 %v33_v8 }
  0xa7   :  { %v35_v9 = vpop.xlane.xlu0 %34 }
  0xa8   :  { %53 = vlog2.f32 %v35_v9 }
  0xa9   :  { %55 = vrcp.f32 %v39_v10 }
  0xb2   :  { %v54_v11 = vpop.eup %53 }
  0xb3   :  { %v37_v12 = vmul.f32 0.6931472, %v54_v11  ;;  %v56_v13 = vpop.eup %55 }
  0xb5   :  { %v51_v14 = vadd.f32 -5.5451775, %v37_v12 }
  0xb7   :  { %v41_v15 = vmul.f32 %v56_v13, %v51_v14 }
  0xb9   :  { %v42_v16 = vmul.f32 1.442695, %v41_v15 }
  0xbb   :  { %57 = vpow2.f32 %v42_v16 }
  0xc5   :  { %v58_v17 = vpop.eup %57 }
  0xc6   :  { %45 = vst.msk [vmem:[%s119_s2] sm:$0xff] %vm44_vm0, %v58_v17 }
  0xc7   :  { %50 = vsyncpa [#allocation4], 1 }

</bundles_post_ra>
